<compile_context>
chip_gen: v5e
topology: v5e:2x2
jax: 0.10.0
libtpu: 0.0.40
codegen_flags: <defaults>
</compile_context>

<pallas_src>
import jax
import jax.numpy as jnp
from jax.experimental import pallas as pl
from jax.experimental.pallas import tpu as pltpu

VOCAB = 16            # input_size (vocabulary)
HIDDEN = 64           # hidden_size (matches the PyTorch spec: hidden_size = 64)
SEQ = 8               # encoder steps fused into one kernel invocation
GATES = 3 * HIDDEN    # fused [r | z | n] gate width (torch gate order)
GP = 4 * HIDDEN       # gate width zero-padded to a multiple of 128 lanes


def encoder_gru_kernel(x_ref,       # (SEQ, H)  bf16  embedded tokens (resident)
                       h0_ref,      # (1, H)    f32   initial hidden state
                       wih_ref,     # (H, GP)   bf16  W_ih^T fused+padded [r|z|n|0]
                       whh_ref,     # (H, GP)   bf16  W_hh^T fused+padded [r|z|n|0]
                       bih_ref,     # (1, GP)   f32   b_ih fused+padded
                       bhh_ref,     # (1, GP)   f32   b_hh fused+padded
                       out_ref):    # (SEQ, H)  f32   per-step GRU outputs
    H = HIDDEN
    S = x_ref.shape[0]

    # Prologue: ALL input-side projections in one batched MXU matmul,
    # (S, H) x (H, GP) -- off the serial recurrence chain entirely.
    gi_all = jnp.dot(x_ref[...], wih_ref[...],
                     preferred_element_type=jnp.float32) + bih_ref[...]

    whh = whh_ref[...]            # VMEM-resident weight slab, loaded once
    bhh = bhh_ref[...]

    # Fully-unrolled recurrence (static trip count S); h stays in vregs.
    h = h0_ref[...]                                           # (1, H) f32
    for t in range(S):
        gi = gi_all[t:t + 1, :]                               # (1, GP) static slice
        gh = jnp.dot(h.astype(jnp.bfloat16), whh,
                     preferred_element_type=jnp.float32) + bhh
        # torch.nn.GRU equations, gate order [r, z, n]; f32 elementwise math.
        rz = jax.nn.sigmoid(gi[:, :2 * H] + gh[:, :2 * H])    # full 128-lane vreg
        r = rz[:, :H]
        z = rz[:, H:2 * H]
        n = jnp.tanh(gi[:, 2 * H:3 * H] + r * gh[:, 2 * H:3 * H])
        h = (1.0 - z) * n + z * h
        out_ref[t:t + 1, :] = h                               # last row == final hidden


def encoder_rnn_forward(tokens, hidden, params):
    """tokens: int32 (S,); hidden: (1, 1, H).

    Runs S GRU single-steps (identical per-step semantics to
    EncoderRNN.forward) inside one grid-less pallas_call. Returns
    (outputs, hidden) with outputs shaped (S, 1, H) and hidden (1, 1, H),
    matching torch.
    """
    emb_bf, wih_t, whh_t, bih, bhh = params
    S = tokens.shape[0]
    H = HIDDEN

    # nn.Embedding lookup: a single tiny gather in the XLA wrapper so the
    # kernel sees one resident (S, H) bf16 slab (no per-step DMAs).
    tok = jnp.clip(tokens.astype(jnp.int32), 0, VOCAB - 1)    # guard OOB gather
    x_all = jnp.take(emb_bf, tok, axis=0)                     # (S, H) bf16
    h0 = hidden.reshape(1, H).astype(jnp.float32)

    cost = pl.CostEstimate(
        flops=4 * S * H * GP,                       # prologue matmul + S hh matmuls
        transcendentals=S * 3 * H,                  # 2 sigmoid + 1 tanh per element
        bytes_accessed=(S * H * 2                   # bf16 embedded inputs
                        + 2 * H * GP * 2            # bf16 weight slabs
                        + 2 * GP * 4                # f32 biases
                        + (S + 1) * H * 4),         # h0 + output slab
    )

    out_seq = pl.pallas_call(
        encoder_gru_kernel,
        out_shape=jax.ShapeDtypeStruct((S, H), jnp.float32),
        in_specs=[pl.BlockSpec(memory_space=pltpu.MemorySpace.VMEM)] * 6,
        out_specs=pl.BlockSpec(memory_space=pltpu.MemorySpace.VMEM),
        cost_estimate=cost,
    )(x_all, h0, wih_t, whh_t, bih, bhh)

    # TODO(synk): with a real batch dimension, add a leading "parallel" grid
    # axis so v7x can shard batches across its two TensorCores.
    return out_seq.reshape(S, 1, H), out_seq[S - 1].reshape(1, 1, H)


def make_params(key):
    """Deterministic parameters with PyTorch-like init distributions."""
    H = HIDDEN
    k_emb, k_wih, k_whh, k_bih, k_bhh = jax.random.split(key, 5)
    k = 1.0 / jnp.sqrt(jnp.float32(H))
    emb = jax.random.normal(k_emb, (VOCAB, H), jnp.float32)            # nn.Embedding ~ N(0,1)
    w_ih = jax.random.uniform(k_wih, (3 * H, H), jnp.float32, -k, k)   # nn.GRU weight_ih_l0
    w_hh = jax.random.uniform(k_whh, (3 * H, H), jnp.float32, -k, k)   # nn.GRU weight_hh_l0
    b_ih = jax.random.uniform(k_bih, (3 * H,), jnp.float32, -k, k)
    b_hh = jax.random.uniform(k_bhh, (3 * H,), jnp.float32, -k, k)

    # Kernel layout: bf16 weights; fused gate slabs transposed to (H, 3H) so
    # x @ W^T is one matmul, then zero-padded to GP = 4H = 256 lanes.
    pad_w = lambda w: jnp.pad(w.T, ((0, 0), (0, GP - GATES)))          # (H, GP)
    pad_b = lambda b: jnp.pad(b, (0, GP - GATES)).reshape(1, GP)       # (1, GP)
    kernel_params = (emb.astype(jnp.bfloat16),
                     pad_w(w_ih).astype(jnp.bfloat16),
                     pad_w(w_hh).astype(jnp.bfloat16),
                     pad_b(b_ih), pad_b(b_hh))
    raw_params = (emb, w_ih, w_hh, b_ih, b_hh)
    return kernel_params, raw_params


def reference_forward(tokens, hidden, raw_params):
    """Pure-JAX reference: S sequential torch.nn.GRU single-steps, using the
    same bf16 weight/input/hidden rounding as the kernel and f32 gate math."""
    emb, w_ih, w_hh, b_ih, b_hh = raw_params
    H = HIDDEN
    emb_bf = emb.astype(jnp.bfloat16).astype(jnp.float32)
    wih = w_ih.astype(jnp.bfloat16).astype(jnp.float32)
    whh = w_hh.astype(jnp.bfloat16).astype(jnp.float32)
    h = hidden.reshape(1, H).astype(jnp.float32)
    outs = []
    for t in range(tokens.shape[0]):
        x = emb_bf[tokens[t]].reshape(1, H)
        hb = h.astype(jnp.bfloat16).astype(jnp.float32)
        gi = x @ wih.T + b_ih
        gh = hb @ whh.T + b_hh
        i_r, i_z, i_n = gi[:, :H], gi[:, H:2 * H], gi[:, 2 * H:]
        h_r, h_z, h_n = gh[:, :H], gh[:, H:2 * H], gh[:, 2 * H:]
        r = jax.nn.sigmoid(i_r + h_r)
        z = jax.nn.sigmoid(i_z + h_z)
        n = jnp.tanh(i_n + r * h_n)
        h = (1.0 - z) * n + z * h
        outs.append(h)
    return jnp.stack(outs, 0).reshape(-1, 1, H), h.reshape(1, 1, H)


if __name__ == "__main__":
    key = jax.random.PRNGKey(0)
    params, raw_params = make_params(key)

    tokens = jax.random.randint(jax.random.fold_in(key, 7), (SEQ,), 0, VOCAB,
                                dtype=jnp.int32)
    hidden0 = jnp.zeros((1, 1, HIDDEN), dtype=jnp.float32)     # initHidden()

    out, h_new = encoder_rnn_forward(tokens, hidden0, params)
    out = jax.block_until_ready(out)
    h_new = jax.block_until_ready(h_new)

    ref_out, ref_h = reference_forward(tokens, hidden0, raw_params)
    assert out.shape == (SEQ, 1, HIDDEN) and h_new.shape == (1, 1, HIDDEN)
    assert jnp.allclose(out, ref_out, atol=1e-3, rtol=1e-3), \
        float(jnp.max(jnp.abs(out - ref_out)))
    assert jnp.allclose(h_new, ref_h, atol=1e-3, rtol=1e-3), \
        float(jnp.max(jnp.abs(h_new - ref_h)))

    print("KERNEL_OK")
</pallas_src>

<mosaic_0001>
module attributes {stable_mosaic.version = 11 : i64} {
  func.func @encoder_gru_kernel(%arg0: memref<8x64xbf16, #tpu.memory_space<vmem>>, %arg1: memref<1x64xf32, #tpu.memory_space<vmem>>, %arg2: memref<64x256xbf16, #tpu.memory_space<vmem>>, %arg3: memref<64x256xbf16, #tpu.memory_space<vmem>>, %arg4: memref<1x256xf32, #tpu.memory_space<vmem>>, %arg5: memref<1x256xf32, #tpu.memory_space<vmem>>, %arg6: memref<8x64xf32, #tpu.memory_space<vmem>>) attributes {dimension_semantics = [], scalar_prefetch = 0 : i64, scratch_operands = 0 : i64, tpu.core_type = #tpu.core_type<tc>} {
    %c0 = arith.constant 0 : index
    %c0_0 = arith.constant 0 : index
    %0 = vector.load %arg0[%c0, %c0_0] : memref<8x64xbf16, #tpu.memory_space<vmem>>, vector<8x64xbf16>
    %c0_1 = arith.constant 0 : index
    %c0_2 = arith.constant 0 : index
    %1 = vector.load %arg2[%c0_1, %c0_2] : memref<64x256xbf16, #tpu.memory_space<vmem>>, vector<64x256xbf16>
    %cst = arith.constant dense<0.000000e+00> : vector<8x256xf32>
    %2 = tpu.matmul %0, %1, %cst {dimension_numbers = #tpu.dot_dimension_numbers<[1], [0], [0], [1], [0, 0, 1, 1], [], []>} : vector<8x64xbf16>, vector<64x256xbf16>, vector<8x256xf32> -> vector<8x256xf32>
    %c0_3 = arith.constant 0 : index
    %c0_4 = arith.constant 0 : index
    %3 = vector.load %arg4[%c0_3, %c0_4] : memref<1x256xf32, #tpu.memory_space<vmem>>, vector<1x256xf32>
    %4 = vector.broadcast %3 : vector<1x256xf32> to vector<8x256xf32>
    %5 = arith.addf %2, %4 : vector<8x256xf32>
    %c0_5 = arith.constant 0 : index
    %c0_6 = arith.constant 0 : index
    %6 = vector.load %arg3[%c0_5, %c0_6] : memref<64x256xbf16, #tpu.memory_space<vmem>>, vector<64x256xbf16>
    %c0_7 = arith.constant 0 : index
    %c0_8 = arith.constant 0 : index
    %7 = vector.load %arg5[%c0_7, %c0_8] : memref<1x256xf32, #tpu.memory_space<vmem>>, vector<1x256xf32>
    %c0_9 = arith.constant 0 : index
    %c0_10 = arith.constant 0 : index
    %8 = vector.load %arg1[%c0_9, %c0_10] : memref<1x64xf32, #tpu.memory_space<vmem>>, vector<1x64xf32>
    %9 = vector.extract_strided_slice %5 {offsets = [0, 0], sizes = [1, 256], strides = [1, 1]} : vector<8x256xf32> to vector<1x256xf32>
    %10 = arith.truncf %8 : vector<1x64xf32> to vector<1x64xbf16>
    %cst_11 = arith.constant dense<0.000000e+00> : vector<1x256xf32>
    %11 = tpu.matmul %10, %6, %cst_11 {dimension_numbers = #tpu.dot_dimension_numbers<[1], [0], [0], [1], [0, 0, 1, 1], [], []>} : vector<1x64xbf16>, vector<64x256xbf16>, vector<1x256xf32> -> vector<1x256xf32>
    %12 = arith.addf %11, %7 : vector<1x256xf32>
    %13 = vector.extract_strided_slice %9 {offsets = [0, 0], sizes = [1, 128], strides = [1, 1]} : vector<1x256xf32> to vector<1x128xf32>
    %14 = vector.extract_strided_slice %12 {offsets = [0, 0], sizes = [1, 128], strides = [1, 1]} : vector<1x256xf32> to vector<1x128xf32>
    %15 = arith.addf %13, %14 : vector<1x128xf32>
    %16 = arith.negf %15 : vector<1x128xf32>
    %17 = math.exp %16 : vector<1x128xf32>
    %cst_12 = arith.constant 1.000000e+00 : f32
    %18 = vector.broadcast %cst_12 : f32 to vector<1x128xf32>
    %19 = arith.addf %18, %17 : vector<1x128xf32>
    %20 = arith.divf %18, %19 : vector<1x128xf32>
    %21 = vector.extract_strided_slice %20 {offsets = [0, 0], sizes = [1, 64], strides = [1, 1]} : vector<1x128xf32> to vector<1x64xf32>
    %22 = vector.extract_strided_slice %20 {offsets = [0, 64], sizes = [1, 64], strides = [1, 1]} : vector<1x128xf32> to vector<1x64xf32>
    %23 = vector.extract_strided_slice %9 {offsets = [0, 128], sizes = [1, 64], strides = [1, 1]} : vector<1x256xf32> to vector<1x64xf32>
    %24 = vector.extract_strided_slice %12 {offsets = [0, 128], sizes = [1, 64], strides = [1, 1]} : vector<1x256xf32> to vector<1x64xf32>
    %25 = arith.mulf %21, %24 : vector<1x64xf32>
    %26 = arith.addf %23, %25 : vector<1x64xf32>
    %27 = math.tanh %26 : vector<1x64xf32>
    %cst_13 = arith.constant 1.000000e+00 : f32
    %28 = vector.broadcast %cst_13 : f32 to vector<1x64xf32>
    %29 = arith.subf %28, %22 : vector<1x64xf32>
    %30 = arith.mulf %29, %27 : vector<1x64xf32>
    %31 = arith.mulf %22, %8 : vector<1x64xf32>
    %32 = arith.addf %30, %31 : vector<1x64xf32>
    %c0_14 = arith.constant 0 : index
    %c0_15 = arith.constant 0 : index
    %33 = vector.load %arg6[%c0_14, %c0_15] : memref<8x64xf32, #tpu.memory_space<vmem>>, vector<1x64xf32>
    tpu.vector_store %arg6[%c0_14, %c0_15], %32 {strides = array<i32>} : memref<8x64xf32, #tpu.memory_space<vmem>>, vector<1x64xf32>,
    %34 = vector.extract_strided_slice %5 {offsets = [1, 0], sizes = [1, 256], strides = [1, 1]} : vector<8x256xf32> to vector<1x256xf32>
    %35 = arith.truncf %32 : vector<1x64xf32> to vector<1x64xbf16>
    %cst_16 = arith.constant dense<0.000000e+00> : vector<1x256xf32>
    %36 = tpu.matmul %35, %6, %cst_16 {dimension_numbers = #tpu.dot_dimension_numbers<[1], [0], [0], [1], [0, 0, 1, 1], [], []>} : vector<1x64xbf16>, vector<64x256xbf16>, vector<1x256xf32> -> vector<1x256xf32>
    %37 = arith.addf %36, %7 : vector<1x256xf32>
    %38 = vector.extract_strided_slice %34 {offsets = [0, 0], sizes = [1, 128], strides = [1, 1]} : vector<1x256xf32> to vector<1x128xf32>
    %39 = vector.extract_strided_slice %37 {offsets = [0, 0], sizes = [1, 128], strides = [1, 1]} : vector<1x256xf32> to vector<1x128xf32>
    %40 = arith.addf %38, %39 : vector<1x128xf32>
    %41 = arith.negf %40 : vector<1x128xf32>
    %42 = math.exp %41 : vector<1x128xf32>
    %cst_17 = arith.constant 1.000000e+00 : f32
    %43 = vector.broadcast %cst_17 : f32 to vector<1x128xf32>
    %44 = arith.addf %43, %42 : vector<1x128xf32>
    %45 = arith.divf %43, %44 : vector<1x128xf32>
    %46 = vector.extract_strided_slice %45 {offsets = [0, 0], sizes = [1, 64], strides = [1, 1]} : vector<1x128xf32> to vector<1x64xf32>
    %47 = vector.extract_strided_slice %45 {offsets = [0, 64], sizes = [1, 64], strides = [1, 1]} : vector<1x128xf32> to vector<1x64xf32>
    %48 = vector.extract_strided_slice %34 {offsets = [0, 128], sizes = [1, 64], strides = [1, 1]} : vector<1x256xf32> to vector<1x64xf32>
    %49 = vector.extract_strided_slice %37 {offsets = [0, 128], sizes = [1, 64], strides = [1, 1]} : vector<1x256xf32> to vector<1x64xf32>
    %50 = arith.mulf %46, %49 : vector<1x64xf32>
    %51 = arith.addf %48, %50 : vector<1x64xf32>
    %52 = math.tanh %51 : vector<1x64xf32>
    %cst_18 = arith.constant 1.000000e+00 : f32
    %53 = vector.broadcast %cst_18 : f32 to vector<1x64xf32>
    %54 = arith.subf %53, %47 : vector<1x64xf32>
    %55 = arith.mulf %54, %52 : vector<1x64xf32>
    %56 = arith.mulf %47, %32 : vector<1x64xf32>
    %57 = arith.addf %55, %56 : vector<1x64xf32>
    %c1 = arith.constant 1 : index
    %c0_19 = arith.constant 0 : index
    %58 = vector.load %arg6[%c1, %c0_19] : memref<8x64xf32, #tpu.memory_space<vmem>>, vector<1x64xf32>
    tpu.vector_store %arg6[%c1, %c0_19], %57 {strides = array<i32>} : memref<8x64xf32, #tpu.memory_space<vmem>>, vector<1x64xf32>,
    %59 = vector.extract_strided_slice %5 {offsets = [2, 0], sizes = [1, 256], strides = [1, 1]} : vector<8x256xf32> to vector<1x256xf32>
    %60 = arith.truncf %57 : vector<1x64xf32> to vector<1x64xbf16>
    %cst_20 = arith.constant dense<0.000000e+00> : vector<1x256xf32>
    %61 = tpu.matmul %60, %6, %cst_20 {dimension_numbers = #tpu.dot_dimension_numbers<[1], [0], [0], [1], [0, 0, 1, 1], [], []>} : vector<1x64xbf16>, vector<64x256xbf16>, vector<1x256xf32> -> vector<1x256xf32>
    %62 = arith.addf %61, %7 : vector<1x256xf32>
    %63 = vector.extract_strided_slice %59 {offsets = [0, 0], sizes = [1, 128], strides = [1, 1]} : vector<1x256xf32> to vector<1x128xf32>
    %64 = vector.extract_strided_slice %62 {offsets = [0, 0], sizes = [1, 128], strides = [1, 1]} : vector<1x256xf32> to vector<1x128xf32>
    %65 = arith.addf %63, %64 : vector<1x128xf32>
    %66 = arith.negf %65 : vector<1x128xf32>
    %67 = math.exp %66 : vector<1x128xf32>
    %cst_21 = arith.constant 1.000000e+00 : f32
    %68 = vector.broadcast %cst_21 : f32 to vector<1x128xf32>
    %69 = arith.addf %68, %67 : vector<1x128xf32>
    %70 = arith.divf %68, %69 : vector<1x128xf32>
    %71 = vector.extract_strided_slice %70 {offsets = [0, 0], sizes = [1, 64], strides = [1, 1]} : vector<1x128xf32> to vector<1x64xf32>
    %72 = vector.extract_strided_slice %70 {offsets = [0, 64], sizes = [1, 64], strides = [1, 1]} : vector<1x128xf32> to vector<1x64xf32>
    %73 = vector.extract_strided_slice %59 {offsets = [0, 128], sizes = [1, 64], strides = [1, 1]} : vector<1x256xf32> to vector<1x64xf32>
    %74 = vector.extract_strided_slice %62 {offsets = [0, 128], sizes = [1, 64], strides = [1, 1]} : vector<1x256xf32> to vector<1x64xf32>
    %75 = arith.mulf %71, %74 : vector<1x64xf32>
    %76 = arith.addf %73, %75 : vector<1x64xf32>
    %77 = math.tanh %76 : vector<1x64xf32>
    %cst_22 = arith.constant 1.000000e+00 : f32
    %78 = vector.broadcast %cst_22 : f32 to vector<1x64xf32>
    %79 = arith.subf %78, %72 : vector<1x64xf32>
    %80 = arith.mulf %79, %77 : vector<1x64xf32>
    %81 = arith.mulf %72, %57 : vector<1x64xf32>
    %82 = arith.addf %80, %81 : vector<1x64xf32>
    %c2 = arith.constant 2 : index
    %c0_23 = arith.constant 0 : index
    %83 = vector.load %arg6[%c2, %c0_23] : memref<8x64xf32, #tpu.memory_space<vmem>>, vector<1x64xf32>
    tpu.vector_store %arg6[%c2, %c0_23], %82 {strides = array<i32>} : memref<8x64xf32, #tpu.memory_space<vmem>>, vector<1x64xf32>,
    %84 = vector.extract_strided_slice %5 {offsets = [3, 0], sizes = [1, 256], strides = [1, 1]} : vector<8x256xf32> to vector<1x256xf32>
    %85 = arith.truncf %82 : vector<1x64xf32> to vector<1x64xbf16>
    %cst_24 = arith.constant dense<0.000000e+00> : vector<1x256xf32>
    %86 = tpu.matmul %85, %6, %cst_24 {dimension_numbers = #tpu.dot_dimension_numbers<[1], [0], [0], [1], [0, 0, 1, 1], [], []>} : vector<1x64xbf16>, vector<64x256xbf16>, vector<1x256xf32> -> vector<1x256xf32>
    %87 = arith.addf %86, %7 : vector<1x256xf32>
    %88 = vector.extract_strided_slice %84 {offsets = [0, 0], sizes = [1, 128], strides = [1, 1]} : vector<1x256xf32> to vector<1x128xf32>
    %89 = vector.extract_strided_slice %87 {offsets = [0, 0], sizes = [1, 128], strides = [1, 1]} : vector<1x256xf32> to vector<1x128xf32>
    %90 = arith.addf %88, %89 : vector<1x128xf32>
    %91 = arith.negf %90 : vector<1x128xf32>
    %92 = math.exp %91 : vector<1x128xf32>
    %cst_25 = arith.constant 1.000000e+00 : f32
    %93 = vector.broadcast %cst_25 : f32 to vector<1x128xf32>
    %94 = arith.addf %93, %92 : vector<1x128xf32>
    %95 = arith.divf %93, %94 : vector<1x128xf32>
    %96 = vector.extract_strided_slice %95 {offsets = [0, 0], sizes = [1, 64], strides = [1, 1]} : vector<1x128xf32> to vector<1x64xf32>
    %97 = vector.extract_strided_slice %95 {offsets = [0, 64], sizes = [1, 64], strides = [1, 1]} : vector<1x128xf32> to vector<1x64xf32>
    %98 = vector.extract_strided_slice %84 {offsets = [0, 128], sizes = [1, 64], strides = [1, 1]} : vector<1x256xf32> to vector<1x64xf32>
    %99 = vector.extract_strided_slice %87 {offsets = [0, 128], sizes = [1, 64], strides = [1, 1]} : vector<1x256xf32> to vector<1x64xf32>
    %100 = arith.mulf %96, %99 : vector<1x64xf32>
    %101 = arith.addf %98, %100 : vector<1x64xf32>
    %102 = math.tanh %101 : vector<1x64xf32>
    %cst_26 = arith.constant 1.000000e+00 : f32
    %103 = vector.broadcast %cst_26 : f32 to vector<1x64xf32>
    %104 = arith.subf %103, %97 : vector<1x64xf32>
    %105 = arith.mulf %104, %102 : vector<1x64xf32>
    %106 = arith.mulf %97, %82 : vector<1x64xf32>
    %107 = arith.addf %105, %106 : vector<1x64xf32>
    %c3 = arith.constant 3 : index
    %c0_27 = arith.constant 0 : index
    %108 = vector.load %arg6[%c3, %c0_27] : memref<8x64xf32, #tpu.memory_space<vmem>>, vector<1x64xf32>
    tpu.vector_store %arg6[%c3, %c0_27], %107 {strides = array<i32>} : memref<8x64xf32, #tpu.memory_space<vmem>>, vector<1x64xf32>,
    %109 = vector.extract_strided_slice %5 {offsets = [4, 0], sizes = [1, 256], strides = [1, 1]} : vector<8x256xf32> to vector<1x256xf32>
    %110 = arith.truncf %107 : vector<1x64xf32> to vector<1x64xbf16>
    %cst_28 = arith.constant dense<0.000000e+00> : vector<1x256xf32>
    %111 = tpu.matmul %110, %6, %cst_28 {dimension_numbers = #tpu.dot_dimension_numbers<[1], [0], [0], [1], [0, 0, 1, 1], [], []>} : vector<1x64xbf16>, vector<64x256xbf16>, vector<1x256xf32> -> vector<1x256xf32>
    %112 = arith.addf %111, %7 : vector<1x256xf32>
    %113 = vector.extract_strided_slice %109 {offsets = [0, 0], sizes = [1, 128], strides = [1, 1]} : vector<1x256xf32> to vector<1x128xf32>
    %114 = vector.extract_strided_slice %112 {offsets = [0, 0], sizes = [1, 128], strides = [1, 1]} : vector<1x256xf32> to vector<1x128xf32>
    %115 = arith.addf %113, %114 : vector<1x128xf32>
    %116 = arith.negf %115 : vector<1x128xf32>
    %117 = math.exp %116 : vector<1x128xf32>
    %cst_29 = arith.constant 1.000000e+00 : f32
    %118 = vector.broadcast %cst_29 : f32 to vector<1x128xf32>
    %119 = arith.addf %118, %117 : vector<1x128xf32>
    %120 = arith.divf %118, %119 : vector<1x128xf32>
    %121 = vector.extract_strided_slice %120 {offsets = [0, 0], sizes = [1, 64], strides = [1, 1]} : vector<1x128xf32> to vector<1x64xf32>
    %122 = vector.extract_strided_slice %120 {offsets = [0, 64], sizes = [1, 64], strides = [1, 1]} : vector<1x128xf32> to vector<1x64xf32>
    %123 = vector.extract_strided_slice %109 {offsets = [0, 128], sizes = [1, 64], strides = [1, 1]} : vector<1x256xf32> to vector<1x64xf32>
    %124 = vector.extract_strided_slice %112 {offsets = [0, 128], sizes = [1, 64], strides = [1, 1]} : vector<1x256xf32> to vector<1x64xf32>
    %125 = arith.mulf %121, %124 : vector<1x64xf32>
    %126 = arith.addf %123, %125 : vector<1x64xf32>
    %127 = math.tanh %126 : vector<1x64xf32>
    %cst_30 = arith.constant 1.000000e+00 : f32
    %128 = vector.broadcast %cst_30 : f32 to vector<1x64xf32>
    %129 = arith.subf %128, %122 : vector<1x64xf32>
    %130 = arith.mulf %129, %127 : vector<1x64xf32>
    %131 = arith.mulf %122, %107 : vector<1x64xf32>
    %132 = arith.addf %130, %131 : vector<1x64xf32>
    %c4 = arith.constant 4 : index
    %c0_31 = arith.constant 0 : index
    %133 = vector.load %arg6[%c4, %c0_31] : memref<8x64xf32, #tpu.memory_space<vmem>>, vector<1x64xf32>
    tpu.vector_store %arg6[%c4, %c0_31], %132 {strides = array<i32>} : memref<8x64xf32, #tpu.memory_space<vmem>>, vector<1x64xf32>,
    %134 = vector.extract_strided_slice %5 {offsets = [5, 0], sizes = [1, 256], strides = [1, 1]} : vector<8x256xf32> to vector<1x256xf32>
    %135 = arith.truncf %132 : vector<1x64xf32> to vector<1x64xbf16>
    %cst_32 = arith.constant dense<0.000000e+00> : vector<1x256xf32>
    %136 = tpu.matmul %135, %6, %cst_32 {dimension_numbers = #tpu.dot_dimension_numbers<[1], [0], [0], [1], [0, 0, 1, 1], [], []>} : vector<1x64xbf16>, vector<64x256xbf16>, vector<1x256xf32> -> vector<1x256xf32>
    %137 = arith.addf %136, %7 : vector<1x256xf32>
    %138 = vector.extract_strided_slice %134 {offsets = [0, 0], sizes = [1, 128], strides = [1, 1]} : vector<1x256xf32> to vector<1x128xf32>
    %139 = vector.extract_strided_slice %137 {offsets = [0, 0], sizes = [1, 128], strides = [1, 1]} : vector<1x256xf32> to vector<1x128xf32>
    %140 = arith.addf %138, %139 : vector<1x128xf32>
    %141 = arith.negf %140 : vector<1x128xf32>
    %142 = math.exp %141 : vector<1x128xf32>
    %cst_33 = arith.constant 1.000000e+00 : f32
    %143 = vector.broadcast %cst_33 : f32 to vector<1x128xf32>
    %144 = arith.addf %143, %142 : vector<1x128xf32>
    %145 = arith.divf %143, %144 : vector<1x128xf32>
    %146 = vector.extract_strided_slice %145 {offsets = [0, 0], sizes = [1, 64], strides = [1, 1]} : vector<1x128xf32> to vector<1x64xf32>
    %147 = vector.extract_strided_slice %145 {offsets = [0, 64], sizes = [1, 64], strides = [1, 1]} : vector<1x128xf32> to vector<1x64xf32>
    %148 = vector.extract_strided_slice %134 {offsets = [0, 128], sizes = [1, 64], strides = [1, 1]} : vector<1x256xf32> to vector<1x64xf32>
    %149 = vector.extract_strided_slice %137 {offsets = [0, 128], sizes = [1, 64], strides = [1, 1]} : vector<1x256xf32> to vector<1x64xf32>
    %150 = arith.mulf %146, %149 : vector<1x64xf32>
    %151 = arith.addf %148, %150 : vector<1x64xf32>
    %152 = math.tanh %151 : vector<1x64xf32>
    %cst_34 = arith.constant 1.000000e+00 : f32
    %153 = vector.broadcast %cst_34 : f32 to vector<1x64xf32>
    %154 = arith.subf %153, %147 : vector<1x64xf32>
    %155 = arith.mulf %154, %152 : vector<1x64xf32>
    %156 = arith.mulf %147, %132 : vector<1x64xf32>
    %157 = arith.addf %155, %156 : vector<1x64xf32>
    %c5 = arith.constant 5 : index
    %c0_35 = arith.constant 0 : index
    %158 = vector.load %arg6[%c5, %c0_35] : memref<8x64xf32, #tpu.memory_space<vmem>>, vector<1x64xf32>
    tpu.vector_store %arg6[%c5, %c0_35], %157 {strides = array<i32>} : memref<8x64xf32, #tpu.memory_space<vmem>>, vector<1x64xf32>,
    %159 = vector.extract_strided_slice %5 {offsets = [6, 0], sizes = [1, 256], strides = [1, 1]} : vector<8x256xf32> to vector<1x256xf32>
    %160 = arith.truncf %157 : vector<1x64xf32> to vector<1x64xbf16>
    %cst_36 = arith.constant dense<0.000000e+00> : vector<1x256xf32>
    %161 = tpu.matmul %160, %6, %cst_36 {dimension_numbers = #tpu.dot_dimension_numbers<[1], [0], [0], [1], [0, 0, 1, 1], [], []>} : vector<1x64xbf16>, vector<64x256xbf16>, vector<1x256xf32> -> vector<1x256xf32>
    %162 = arith.addf %161, %7 : vector<1x256xf32>
    %163 = vector.extract_strided_slice %159 {offsets = [0, 0], sizes = [1, 128], strides = [1, 1]} : vector<1x256xf32> to vector<1x128xf32>
    %164 = vector.extract_strided_slice %162 {offsets = [0, 0], sizes = [1, 128], strides = [1, 1]} : vector<1x256xf32> to vector<1x128xf32>
    %165 = arith.addf %163, %164 : vector<1x128xf32>
    %166 = arith.negf %165 : vector<1x128xf32>
    %167 = math.exp %166 : vector<1x128xf32>
    %cst_37 = arith.constant 1.000000e+00 : f32
    %168 = vector.broadcast %cst_37 : f32 to vector<1x128xf32>
    %169 = arith.addf %168, %167 : vector<1x128xf32>
    %170 = arith.divf %168, %169 : vector<1x128xf32>
    %171 = vector.extract_strided_slice %170 {offsets = [0, 0], sizes = [1, 64], strides = [1, 1]} : vector<1x128xf32> to vector<1x64xf32>
    %172 = vector.extract_strided_slice %170 {offsets = [0, 64], sizes = [1, 64], strides = [1, 1]} : vector<1x128xf32> to vector<1x64xf32>
    %173 = vector.extract_strided_slice %159 {offsets = [0, 128], sizes = [1, 64], strides = [1, 1]} : vector<1x256xf32> to vector<1x64xf32>
    %174 = vector.extract_strided_slice %162 {offsets = [0, 128], sizes = [1, 64], strides = [1, 1]} : vector<1x256xf32> to vector<1x64xf32>
    %175 = arith.mulf %171, %174 : vector<1x64xf32>
    %176 = arith.addf %173, %175 : vector<1x64xf32>
    %177 = math.tanh %176 : vector<1x64xf32>
    %cst_38 = arith.constant 1.000000e+00 : f32
    %178 = vector.broadcast %cst_38 : f32 to vector<1x64xf32>
    %179 = arith.subf %178, %172 : vector<1x64xf32>
    %180 = arith.mulf %179, %177 : vector<1x64xf32>
    %181 = arith.mulf %172, %157 : vector<1x64xf32>
    %182 = arith.addf %180, %181 : vector<1x64xf32>
    %c6 = arith.constant 6 : index
    %c0_39 = arith.constant 0 : index
    %183 = vector.load %arg6[%c6, %c0_39] : memref<8x64xf32, #tpu.memory_space<vmem>>, vector<1x64xf32>
    tpu.vector_store %arg6[%c6, %c0_39], %182 {strides = array<i32>} : memref<8x64xf32, #tpu.memory_space<vmem>>, vector<1x64xf32>,
    %184 = vector.extract_strided_slice %5 {offsets = [7, 0], sizes = [1, 256], strides = [1, 1]} : vector<8x256xf32> to vector<1x256xf32>
    %185 = arith.truncf %182 : vector<1x64xf32> to vector<1x64xbf16>
    %cst_40 = arith.constant dense<0.000000e+00> : vector<1x256xf32>
    %186 = tpu.matmul %185, %6, %cst_40 {dimension_numbers = #tpu.dot_dimension_numbers<[1], [0], [0], [1], [0, 0, 1, 1], [], []>} : vector<1x64xbf16>, vector<64x256xbf16>, vector<1x256xf32> -> vector<1x256xf32>
    %187 = arith.addf %186, %7 : vector<1x256xf32>
    %188 = vector.extract_strided_slice %184 {offsets = [0, 0], sizes = [1, 128], strides = [1, 1]} : vector<1x256xf32> to vector<1x128xf32>
    %189 = vector.extract_strided_slice %187 {offsets = [0, 0], sizes = [1, 128], strides = [1, 1]} : vector<1x256xf32> to vector<1x128xf32>
    %190 = arith.addf %188, %189 : vector<1x128xf32>
    %191 = arith.negf %190 : vector<1x128xf32>
    %192 = math.exp %191 : vector<1x128xf32>
    %cst_41 = arith.constant 1.000000e+00 : f32
    %193 = vector.broadcast %cst_41 : f32 to vector<1x128xf32>
    %194 = arith.addf %193, %192 : vector<1x128xf32>
    %195 = arith.divf %193, %194 : vector<1x128xf32>
    %196 = vector.extract_strided_slice %195 {offsets = [0, 0], sizes = [1, 64], strides = [1, 1]} : vector<1x128xf32> to vector<1x64xf32>
    %197 = vector.extract_strided_slice %195 {offsets = [0, 64], sizes = [1, 64], strides = [1, 1]} : vector<1x128xf32> to vector<1x64xf32>
    %198 = vector.extract_strided_slice %184 {offsets = [0, 128], sizes = [1, 64], strides = [1, 1]} : vector<1x256xf32> to vector<1x64xf32>
    %199 = vector.extract_strided_slice %187 {offsets = [0, 128], sizes = [1, 64], strides = [1, 1]} : vector<1x256xf32> to vector<1x64xf32>
    %200 = arith.mulf %196, %199 : vector<1x64xf32>
    %201 = arith.addf %198, %200 : vector<1x64xf32>
    %202 = math.tanh %201 : vector<1x64xf32>
    %cst_42 = arith.constant 1.000000e+00 : f32
    %203 = vector.broadcast %cst_42 : f32 to vector<1x64xf32>
    %204 = arith.subf %203, %197 : vector<1x64xf32>
    %205 = arith.mulf %204, %202 : vector<1x64xf32>
    %206 = arith.mulf %197, %182 : vector<1x64xf32>
    %207 = arith.addf %205, %206 : vector<1x64xf32>
    %c7 = arith.constant 7 : index
    %c0_43 = arith.constant 0 : index
    %208 = vector.load %arg6[%c7, %c0_43] : memref<8x64xf32, #tpu.memory_space<vmem>>, vector<1x64xf32>
    tpu.vector_store %arg6[%c7, %c0_43], %207 {strides = array<i32>} : memref<8x64xf32, #tpu.memory_space<vmem>>, vector<1x64xf32>,
    return
  }
}

</mosaic_0001>

<bundles_post_ra>
// kernel: tpu_custom_call.1
= control target key start
LH: loop header
LB: loop body
LE: loop exit
PB: predicated region body
PF: predicated region fallthrough
CT: control target
= control target key end

     0   :  { %11 = vsyncpa [#allocation3], 0  ;;  %s1425_s0 = inlined_call_operand.hbm [shape: bf16[8,64], index: 0, kind: input, shape index: {}]   ;;  %s1426_s1 = inlined_call_operand.hbm [shape: f32[1,64], index: 1, kind: input, shape index: {}]   ;;  %s1427_s2 = inlined_call_operand.hbm [shape: bf16[64,256], index: 2, kind: input, shape index: {}]   ;;  %s1428_s3 = inlined_call_operand.hbm [shape: bf16[64,256], index: 3, kind: input, shape index: {}]   ;;  %s1429_s4 = inlined_call_operand.vmem [shape: f32[1,256], index: 4, kind: input, shape index: {}]   ;;  %s1430_s5 = inlined_call_operand.vmem [shape: f32[1,256], index: 5, kind: input, shape index: {}]   ;;  %s1431_s6 = inlined_call_operand.hbm [shape: f32[8,64], index: 6, kind: output, shape index: {}]  }
   0x1   :  { %12 = vsyncpa [#allocation6], 0 }
   0x2   :  { %13 = vsyncpa [#allocation9], 0  ;;  %s31_s23 = sshll.u32 %s1426_s1, 4  ;;  %s32_s23 = int_to_ptr.hbm [resolvable:$true] %s31_s23 }
   0x3   :  { %14 = vsyncpa [#allocation4], 0  ;;  %s1163_s24 = smov [#allocation5]   ;;  %s20_s28 = sshll.u32 %s1425_s0, 4  ;;  %s21_s28 = int_to_ptr.hbm [resolvable:$true] %s20_s28 }
   0x4   :  { %s33_s25 = sshll.u32 %s1163_s24, 4  ;;  %s1164_s29 = smov [#allocation2]   ;;  %s34_s25 = int_to_ptr.vmem [resolvable:$true] %s33_s25 }
   0x5   :  { %36 = dma.hbm_to_vmem [thread:$0]  %s32_s23, 16, %s34_s25, [#allocation6]  }
   0x6   :  { %s22_s30 = sshll.u32 %s1164_s29, 4  ;;  %s41_s9 = sshll.u32 %s1427_s2, 4  ;;  %s23_s30 = int_to_ptr.vmem [resolvable:$true] %s22_s30  ;;  %s42_s9 = int_to_ptr.hbm [resolvable:$true] %s41_s9 }
   0x7   :  { %25 = dma.hbm_to_vmem [thread:$0]  %s21_s28, 64, %s23_s30, [#allocation3]  }
   0x8   :  { %s1165_s1 = smov [#allocation7]   ;;  %s54_s13 = sshll.u32 %s1428_s3, 4  ;;  %s55_s13 = int_to_ptr.hbm [resolvable:$true] %s54_s13 }
   0x9   :  { %s43_s10 = sshll.u32 %s1165_s1, 4  ;;  %s1166_s14 = smov 128   ;;  %s44_s10 = int_to_ptr.vmem [resolvable:$true] %s43_s10 }
   0xa   :  { %s1167_s0 = smov 8   ;;  %s1168_s15 = smov [#allocation8]  }
   0xb   :  { %49 = dma.hbm_to_vmem [thread:$0]  %s42_s9, 1024, %s44_s10, [#allocation6], %s1166_s14, %s1166_s14, %s1167_s0  }
   0xc   :  { %s56_s16 = sshll.u32 %s1168_s15, 4  ;;  %s57_s16 = int_to_ptr.vmem [resolvable:$true] %s56_s16 }
   0xd   :  { %62 = dma.hbm_to_vmem [thread:$0]  %s55_s13, 1024, %s57_s16, [#allocation9], %s1166_s14, %s1166_s14, %s1167_s0  }
   0xe   :  { %1155 = dma.done.wait [#allocation3], 64  }
   0xf   :  { %1156 = vsyncadd [#allocation3], 4294967232 }
  0x10   :  { %1157 = dma.done.wait [#allocation6], 1040  }
  0x11   :  { %1158 = vsyncadd [#allocation6], 4294966256 }
  0x12   :  { %1159 = dma.done.wait [#allocation9], 1024  }
  0x13   :  { %1160 = vsyncadd [#allocation9], 4294966272  ;;  %v898_v0 = vld [vmem:[#allocation7 + $0x30] sm:$0xf]  ;;  %v969_v1 = vld [vmem:[#allocation7 + $0x34] sm:$0xf0] }
  0x14   :  { %v932_v2 = vld [vmem:[#allocation8 + $0x30] sm:$0xf]  ;;  %v899_v3 = vor.u32 %v969_v1, %v898_v0  ;;  %v977_v4 = vld [vmem:[#allocation8 + $0x34] sm:$0xf0]  ;;  %v890_v5 = vld [vmem:[#allocation7 + $0x20] sm:$0xf] }
  0x15   :  { %v967_v6 = vld [vmem:[#allocation7 + $0x24] sm:$0xf0]  ;;  %v1218_v7 = vor.u32 %v977_v4, %v932_v2  ;;  %v924_v8 = vld [vmem:[#allocation8 + $0x20] sm:$0xf]  ;;  %v882_v12 = vld [vmem:[#allocation7 + $0x10] sm:$0xf] }
  0x16   :  { %v975_v9 = vld [vmem:[#allocation8 + $0x24] sm:$0xf0]  ;;  %147 = vmatpush.bf16.msra.mxu0 %v899_v3  ;;  %v891_v10 = vor.u32 %v967_v6, %v890_v5  ;;  %v965_v13 = vld [vmem:[#allocation7 + $0x14] sm:$0xf0]  ;;  %v916_v14 = vld [vmem:[#allocation8 + $0x10] sm:$0xf] }
  0x17   :  { %232 = vmatpush.bf16.msra.mxu2 %v1218_v7  ;;  %v1221_v11 = vor.u32 %v975_v9, %v924_v8  ;;  %v973_v15 = vld [vmem:[#allocation8 + $0x14] sm:$0xf0]  ;;  %v976_v16 = vld [vmem:[#allocation8 + $0x34] sm:$0xf]  ;;  %v934_v17 = vld [vmem:[#allocation8 + $0x38] sm:$0xf0]  ;;  %v883_v19 = vor.u32 %v965_v13, %v882_v12 }
  0x18   :  { %v974_v18 = vld [vmem:[#allocation8 + $0x24] sm:$0xf]  ;;  %v1223_v20 = vor.u32 %v976_v16, %v934_v17  ;;  %v926_v21 = vld [vmem:[#allocation8 + $0x28] sm:$0xf0]  ;;  %v968_v22 = vld [vmem:[#allocation7 + $0x34] sm:$0xf]  ;;  %v1226_v24 = vor.u32 %v973_v15, %v916_v14 }
  0x19   :  { %v900_v23 = vld [vmem:[#allocation7 + $0x38] sm:$0xf0]  ;;  %v874_v25 = vld [vmem:[#allocation7] sm:$0xf]  ;;  %v963_v26 = vld [vmem:[#allocation7 + $0x4] sm:$0xf0]  ;;  %v1229_v31 = vor.u32 %v974_v18, %v926_v21 }
  0x1a   :  { %148 = vmatpush.bf16.msra.mxu0 %v891_v10  ;;  %v903_v27 = vor.u32 %v968_v22, %v900_v23  ;;  %v966_v28 = vld [vmem:[#allocation7 + $0x24] sm:$0xf]  ;;  %v908_v29 = vld [vmem:[#allocation8] sm:$0xf]  ;;  %v971_v30 = vld [vmem:[#allocation8 + $0x4] sm:$0xf0]  ;;  %245 = vmatpush.bf16.msra.mxu3 %v1223_v20  ;;  %v875_v36 = vor.u32 %v963_v26, %v874_v25 }
  0x1b   :  { %233 = vmatpush.bf16.msra.mxu2 %v1221_v11  ;;  %v892_v32 = vld [vmem:[#allocation7 + $0x28] sm:$0xf0]  ;;  %v972_v33 = vld [vmem:[#allocation8 + $0x14] sm:$0xf]  ;;  %v918_v34 = vld [vmem:[#allocation8 + $0x18] sm:$0xf0]  ;;  %v1232_v39 = vor.u32 %v971_v30, %v908_v29 }
  0x1c   :  { %160 = vmatpush.bf16.msra.mxu1 %v903_v27  ;;  %v895_v35 = vor.u32 %v966_v28, %v892_v32  ;;  %v964_v37 = vld [vmem:[#allocation7 + $0x14] sm:$0xf]  ;;  %v884_v38 = vld [vmem:[#allocation7 + $0x18] sm:$0xf0]  ;;  %v1235_v41 = vor.u32 %v972_v33, %v918_v34  ;;  %vm139_vm0 = vcmask 523264   ;;  %s860_s22 = sshll.u32 %s1431_s6, 4  ;;  %s861_s22 = int_to_ptr.hbm [resolvable:$true] %s860_s22 }
  0x1d   :  { %v178_v40 = vld [vmem:[#allocation5] sm:$0x1]  ;;  %v970_v42 = vld [vmem:[#allocation8 + $0x4] sm:$0xf]  ;;  %v910_v43 = vld [vmem:[#allocation8 + $0x8] sm:$0xf0]  ;;  %v887_v44 = vor.u32 %v964_v37, %v884_v38 }
  0x1e   :  { %149 = vmatpush.bf16.msra.mxu0 %v883_v19  ;;  %246 = vmatpush.bf16.msra.mxu3 %v1229_v31  ;;  %v84_v45 = vld [vmem:[#allocation2] sm:$0xf]  ;;  %v179_v46 = vpack.c.bf16 %v178_v40, %v178_v40  ;;  %v962_v47 = vld [vmem:[#allocation7 + $0x4] sm:$0xf]  ;;  %v876_v48 = vld [vmem:[#allocation7 + $0x8] sm:$0xf0]  ;;  %v1240_v49 = vor.u32 %v970_v42, %v910_v43 }
  0x1f   :  { %234 = vmatpush.bf16.msra.mxu2 %v1226_v24  ;;  %v879_v50 = vor.u32 %v962_v47, %v876_v48  ;;  %v93_v51 = vld [vmem:[%s1429_s4] sm:$0x3]  ;;  %s1169_s4 = smov 64   ;;  %v986_v26 = vld [vmem:[#allocation5] ss:$0 sm:$0xff] }
  0x20   :  { %161 = vmatpush.bf16.msra.mxu1 %v895_v35  ;;  %v177_v53 = vld [vmem:[%s1430_s5] sm:$0x3]  ;;  %v95_v54 = vperm.slane %v93_v51, 0  ;;  %v96_v14 = vperm.slane %v93_v51, 1  ;;  %s1170_s5 = smov [#allocation10]  }
  0x21   :  { %v1284_v55 = vperm.slane %v177_v53, 0  ;;  %v1290_v8 = vperm.slane %v177_v53, 1  ;;  %s858_s19 = sshll.u32 %s1170_s5, 4  ;;  %s859_s19 = int_to_ptr.vmem [resolvable:$true] %s858_s19 }
  0x22   :  { %150 = vmatpush.bf16.msra.mxu0 %v875_v36  ;;  %247 = vmatpush.bf16.msra.mxu3 %v1235_v41 }
  0x23   :  { %235 = vmatpush.bf16.msra.mxu2 %v1232_v39 }
  0x24   :  { %162 = vmatpush.bf16.msra.mxu1 %v887_v44 }
  0x25   :  { %904 = vmatmul.msk.bf16.vlgmr.msra.gmra.mxu0 %vm139_vm0, %v84_v45 }
  0x26   :  { %307 = vmatpush.bf16.msrb.mxu0 %v1218_v7  ;;  %938 = vmatmul.msk.bf16.vlgmr.msra.gmra.mxu2 %vm139_vm0, %v179_v46 }
  0x27   :  { %387 = vmatpush.bf16.msrb.mxu2 %v1218_v7  ;;  %248 = vmatpush.bf16.msra.mxu3 %v1240_v49 }
  0x28   :  { %163 = vmatpush.bf16.msra.mxu1 %v879_v50 }
  0x2a   :  { %308 = vmatpush.bf16.msrb.mxu0 %v1221_v11  ;;  %939 = vmatmul.msk.bf16.vlgmr.msra.gmra.mxu3 %vm139_vm0, %v179_v46 }
  0x2b   :  { %388 = vmatpush.bf16.msrb.mxu2 %v1221_v11  ;;  %400 = vmatpush.bf16.msrb.mxu3 %v1223_v20 }
  0x2c   :  { %320 = vmatpush.bf16.msrb.mxu1 %v1223_v20 }
  0x2d   :  { %905 = vmatmul.msk.bf16.vlgmr.msra.gmra.mxu1 %vm139_vm0, %v84_v45 }
  0x2e   :  { %309 = vmatpush.bf16.msrb.mxu0 %v1226_v24 }
  0x2f   :  { %389 = vmatpush.bf16.msrb.mxu2 %v1226_v24  ;;  %401 = vmatpush.bf16.msrb.mxu3 %v1229_v31 }
  0x30   :  { %321 = vmatpush.bf16.msrb.mxu1 %v1229_v31 }
  0x32   :  { %310 = vmatpush.bf16.msrb.mxu0 %v1232_v39 }
  0x33   :  { %390 = vmatpush.bf16.msrb.mxu2 %v1232_v39  ;;  %402 = vmatpush.bf16.msrb.mxu3 %v1235_v41 }
  0x34   :  { %322 = vmatpush.bf16.msrb.mxu1 %v1235_v41 }
  0x36   :  { %466 = vmatpush.bf16.msra.mxu0 %v1218_v7 }
  0x37   :  { %547 = vmatpush.bf16.msra.mxu2 %v1218_v7  ;;  %403 = vmatpush.bf16.msrb.mxu3 %v1240_v49 }
  0x38   :  { %323 = vmatpush.bf16.msrb.mxu1 %v1240_v49 }
  0x3a   :  { %467 = vmatpush.bf16.msra.mxu0 %v1221_v11 }
  0x3b   :  { %548 = vmatpush.bf16.msra.mxu2 %v1221_v11  ;;  %560 = vmatpush.bf16.msra.mxu3 %v1223_v20 }
  0x3c   :  { %479 = vmatpush.bf16.msra.mxu1 %v1223_v20 }
  0x3e   :  { %468 = vmatpush.bf16.msra.mxu0 %v1226_v24 }
  0x3f   :  { %549 = vmatpush.bf16.msra.mxu2 %v1226_v24  ;;  %561 = vmatpush.bf16.msra.mxu3 %v1229_v31 }
  0x40   :  { %480 = vmatpush.bf16.msra.mxu1 %v1229_v31 }
  0x42   :  { %469 = vmatpush.bf16.msra.mxu0 %v1232_v39 }
  0x43   :  { %550 = vmatpush.bf16.msra.mxu2 %v1232_v39  ;;  %562 = vmatpush.bf16.msra.mxu3 %v1235_v41 }
  0x44   :  { %481 = vmatpush.bf16.msra.mxu1 %v1235_v41 }
  0x47   :  { %563 = vmatpush.bf16.msra.mxu3 %v1240_v49 }
  0x48   :  { %482 = vmatpush.bf16.msra.mxu1 %v1240_v49 }
  0xa2   :  { %v152_v52 = vpop.f32.mrf.mxu0 }
  0xa3   :  { %v1286_v56 = vadd.f32 %v152_v52, %v95_v54 }
  0xa9   :  { %v237_v57 = vpop.f32.mrf.mxu2 }
  0xaa   :  { %v165_v58 = vpop.f32.mrf.mxu1  ;;  %v238_v59 = vadd.f32 %v237_v57, %v1284_v55  ;;  %v154_v60 = vpop.f32.mrf.mxu0 }
  0xab   :  { %v1293_v19 = vadd.f32 %v165_v58, %v96_v14 }
  0xac   :  { %v254_v61 = vadd.f32 %v238_v59, %v1286_v56 }
  0xad   :  { %v250_v63 = vpop.f32.mrf.mxu3 }
  0xae   :  { %v940_v62 = vmul.f32 -1.442695, %v254_v61  ;;  %v251_v15 = vadd.f32 %v250_v63, %v1290_v8 }
  0xb0   :  { %987 = vpow2.f32 %v940_v62 }
  0xb1   :  { %v239_v0 = vpop.f32.mrf.mxu2 }
  0xb2   :  { %v167_v1 = vpop.f32.mrf.mxu1 }
  0xb5   :  { %v252_v3 = vpop.f32.mrf.mxu3 }
  0xb6   :  { %v988_v2 = vpop.eup %987 }
  0xb7   :  { %v258_v4 = vadd.f32 1.0, %v988_v2 }
  0xb9   :  { %989 = vrcp.f32 %v258_v4  ;;  %v270_v10 = vand.u32 2147483648, %v258_v4  ;;  %v268_v13 = vand.u32 2147483647, %v258_v4  ;;  %vm264_vm2 = vweird.f32 %v258_v4 }
  0xbb   :  { %v271_v17 = vor.u32 1.1754944e-38, %v270_v10  ;;  %vm269_vm4 = vcmp.eq.f32.partialorder %v268_v13, 8.507059e+37 }
  0xbf   :  { %v990_v5 = vpop.eup %989 }
  0xc0   :  { %v260_v6 = vmul.f32 %v990_v5, %v258_v4  ;;  %vm265_vm1 = vweird.f32 %v990_v5 }
  0xc1   :  { %vm266_vm3 = vmor %vm264_vm2, %vm265_vm1 }
  0xc2   :  { %v261_v9 = vsub.f32 1.0, %v260_v6 }
  0xc4   :  { %v262_v12 = vmul.f32 %v990_v5, %v261_v9 }
  0xc6   :  { %v263_v16 = vadd.f32 %v990_v5, %v262_v12 }
  0xc8   :  { %v267_v18 = vsel %vm266_vm3, %v990_v5, %v263_v16 }
  0xc9   :  { %v272_v21 = vsel %vm269_vm4, %v271_v17, %v267_v18 }
  0xca   :  { %v274_v22 = vmul.f32 %v272_v21, %v251_v15  ;;  %v277_v28 = vsub.f32 1.0, %v272_v21 }
  0xcc   :  { %v275_v23 = vadd.f32 %v274_v22, %v1293_v19 }
  0xce   :  { %991 = vtanh.f32 %v275_v23 }
  0xd4   :  { %v992_v25 = vpop.eup %991 }
  0xd5   :  { %279 = vrot.lane.b32.xlu0 %v992_v25, %s1169_s4 }
  0xdd   :  { %285 = vrot.lane.b32.xlu0 %v986_v26, %s1169_s4 }
 0x147   :  { %v280_v27 = vpop.permute.xlu0 %279 }
 0x148   :  { %v282_v30 = vmul.f32 %v280_v27, %v277_v28 }
 0x14f   :  { %v286_v29 = vpop.permute.xlu0 %285 }
 0x150   :  { %v288_v32 = vmul.f32 %v286_v29, %v272_v21 }
 0x152   :  { %v1298_v33 = vadd.f32 %v288_v32, %v282_v30 }
 0x154   :  { %v296_v34 = vpack.c.bf16 %v1298_v33, %v1298_v33  ;;  %v364_v3 = vrot.slane %v1298_v33, 7 }
 0x156   :  { %298 = vrot.lane.b32.xlu1 %v296_v34, %s1169_s4 }
 0x1c8   :  { %v299_v35 = vpop.permute.xlu1 %298 }
 0x1c9   :  { %941 = vmatmul.msk.bf16.vlgmr.msrb.gmra.mxu0 %vm139_vm0, %v299_v35  ;;  %942 = vmatmul.msk.bf16.vlgmr.msrb.gmra.mxu1 %vm139_vm0, %v299_v35 }
 0x1ca   :  { %626 = vmatpush.bf16.msrb.mxu0 %v1218_v7  ;;  %639 = vmatpush.bf16.msrb.mxu1 %v1223_v20 }
 0x1ce   :  { %627 = vmatpush.bf16.msrb.mxu0 %v1221_v11  ;;  %640 = vmatpush.bf16.msrb.mxu1 %v1229_v31 }
 0x1d2   :  { %628 = vmatpush.bf16.msrb.mxu0 %v1226_v24  ;;  %641 = vmatpush.bf16.msrb.mxu1 %v1235_v41 }
 0x1d6   :  { %629 = vmatpush.bf16.msrb.mxu0 %v1232_v39  ;;  %642 = vmatpush.bf16.msrb.mxu1 %v1240_v49 }
 0x246   :  { %v312_v36 = vpop.f32.mrf.mxu0  ;;  %v325_v37 = vpop.f32.mrf.mxu1 }
 0x247   :  { %v313_v38 = vadd.f32 %v312_v36, %v1284_v55  ;;  %v326_v53 = vadd.f32 %v325_v37, %v1290_v8 }
 0x249   :  { %v330_v40 = vrot.slane %v313_v38, 7  ;;  %v353_v61 = vrot.slane %v326_v53, 7 }
 0x24b   :  { %v332_v42 = vadd.f32 %v330_v40, %v1286_v56 }
 0x24d   :  { %v943_v43 = vmul.f32 -1.442695, %v332_v42 }
 0x24e   :  { %v314_v44 = vpop.f32.mrf.mxu0  ;;  %v327_v45 = vpop.f32.mrf.mxu1 }
 0x24f   :  { %993 = vpow2.f32 %v943_v43 }
 0x255   :  { %v994_v46 = vpop.eup %993 }
 0x256   :  { %v336_v47 = vadd.f32 1.0, %v994_v46 }
 0x258   :  { %995 = vrcp.f32 %v336_v47  ;;  %v348_v52 = vand.u32 2147483648, %v336_v47  ;;  %v346_v57 = vand.u32 2147483647, %v336_v47  ;;  %vm342_vm6 = vweird.f32 %v336_v47 }
 0x25a   :  { %v349_v59 = vor.u32 1.1754944e-38, %v348_v52  ;;  %vm347_vm8 = vcmp.eq.f32.partialorder %v346_v57, 8.507059e+37 }
 0x25e   :  { %v996_v48 = vpop.eup %995 }
 0x25f   :  { %v338_v50 = vmul.f32 %v996_v48, %v336_v47  ;;  %vm343_vm5 = vweird.f32 %v996_v48 }
 0x260   :  { %vm344_vm7 = vmor %vm342_vm6, %vm343_vm5 }
 0x261   :  { %v339_v51 = vsub.f32 1.0, %v338_v50 }
 0x263   :  { %v340_v54 = vmul.f32 %v996_v48, %v339_v51 }
 0x265   :  { %v341_v58 = vadd.f32 %v996_v48, %v340_v54 }
 0x267   :  { %v345_v60 = vsel %vm344_vm7, %v996_v48, %v341_v58 }
 0x268   :  { %v350_v62 = vsel %vm347_vm8, %v349_v59, %v345_v60 }
 0x269   :  { %v355_v63 = vmul.f32 %v353_v61, %v350_v62  ;;  %v358_v2 = vsub.f32 1.0, %v350_v62  ;;  %v366_v5 = vmul.f32 %v364_v3, %v350_v62 }
 0x26b   :  { %v356_v0 = vadd.f32 %v355_v63, %v1293_v19 }
 0x26d   :  { %997 = vtanh.f32 %v356_v0 }
 0x273   :  { %v998_v1 = vpop.eup %997 }
 0x274   :  { %360 = vrot.lane.b32.xlu1 %v998_v1, %s1169_s4 }
 0x2e6   :  { %v361_v4 = vpop.permute.xlu1 %360 }
 0x2e7   :  { %v363_v6 = vmul.f32 %v361_v4, %v358_v2 }
 0x2e9   :  { %v1319_v9 = vadd.f32 %v366_v5, %v363_v6 }
 0x2eb   :  { %v374_v10 = vpack.c.bf16 %v1319_v9, %v1319_v9  ;;  %v444_v47 = vrot.slane %v1319_v9, 7 }
 0x2ed   :  { %v376_v12 = vshrl.u32 %v374_v10, 16 }
 0x2ef   :  { %378 = vrot.lane.b32.xlu2 %v376_v12, %s1169_s4 }
 0x349   :  { %v379_v13 = vpop.permute.xlu2 %378 }
 0x34a   :  { %944 = vmatmul.msk.bf16.vlgmr.msrb.gmra.mxu2 %vm139_vm0, %v379_v13  ;;  %945 = vmatmul.msk.bf16.vlgmr.msrb.gmra.mxu3 %vm139_vm0, %v379_v13 }
 0x34b   :  { %707 = vmatpush.bf16.msrb.mxu2 %v1218_v7  ;;  %720 = vmatpush.bf16.msrb.mxu3 %v1223_v20 }
 0x34f   :  { %708 = vmatpush.bf16.msrb.mxu2 %v1221_v11  ;;  %721 = vmatpush.bf16.msrb.mxu3 %v1229_v31 }
 0x353   :  { %709 = vmatpush.bf16.msrb.mxu2 %v1226_v24  ;;  %722 = vmatpush.bf16.msrb.mxu3 %v1235_v41 }
 0x357   :  { %710 = vmatpush.bf16.msrb.mxu2 %v1232_v39  ;;  %723 = vmatpush.bf16.msrb.mxu3 %v1240_v49 }
 0x3cd   :  { %v392_v14 = vpop.f32.mrf.mxu2  ;;  %v405_v15 = vpop.f32.mrf.mxu3 }
 0x3ce   :  { %v393_v16 = vadd.f32 %v392_v14, %v1284_v55  ;;  %v406_v32 = vadd.f32 %v405_v15, %v1290_v8 }
 0x3d0   :  { %v410_v17 = vrot.slane %v393_v16, 6  ;;  %v433_v40 = vrot.slane %v406_v32, 6 }
 0x3d2   :  { %v412_v18 = vadd.f32 %v410_v17, %v1286_v56 }
 0x3d4   :  { %v946_v21 = vmul.f32 -1.442695, %v412_v18 }
 0x3d5   :  { %v394_v22 = vpop.f32.mrf.mxu2  ;;  %v407_v23 = vpop.f32.mrf.mxu3 }
 0x3d6   :  { %999 = vpow2.f32 %v946_v21 }
 0x3dc   :  { %v1000_v25 = vpop.eup %999 }
 0x3dd   :  { %v416_v26 = vadd.f32 1.0, %v1000_v25 }
 0x3df   :  { %1001 = vrcp.f32 %v416_v26  ;;  %v428_v30 = vand.u32 2147483648, %v416_v26  ;;  %v426_v35 = vand.u32 2147483647, %v416_v26  ;;  %vm422_vm10 = vweird.f32 %v416_v26 }
 0x3e1   :  { %v429_v37 = vor.u32 1.1754944e-38, %v428_v30  ;;  %vm427_vm12 = vcmp.eq.f32.partialorder %v426_v35, 8.507059e+37 }
 0x3e5   :  { %v1002_v27 = vpop.eup %1001 }
 0x3e6   :  { %v418_v28 = vmul.f32 %v1002_v27, %v416_v26  ;;  %vm423_vm9 = vweird.f32 %v1002_v27 }
 0x3e7   :  { %vm424_vm11 = vmor %vm422_vm10, %vm423_vm9 }
 0x3e8   :  { %v419_v29 = vsub.f32 1.0, %v418_v28 }
 0x3ea   :  { %v420_v34 = vmul.f32 %v1002_v27, %v419_v29 }
 0x3ec   :  { %v421_v36 = vadd.f32 %v1002_v27, %v420_v34 }
 0x3ee   :  { %v425_v38 = vsel %vm424_vm11, %v1002_v27, %v421_v36 }
 0x3ef   :  { %v430_v42 = vsel %vm427_vm12, %v429_v37, %v425_v38 }
 0x3f0   :  { %v435_v43 = vmul.f32 %v433_v40, %v430_v42  ;;  %v438_v46 = vsub.f32 1.0, %v430_v42  ;;  %v446_v50 = vmul.f32 %v444_v47, %v430_v42 }
 0x3f2   :  { %v436_v44 = vadd.f32 %v435_v43, %v1293_v19 }
 0x3f4   :  { %1003 = vtanh.f32 %v436_v44 }
 0x3fa   :  { %v1004_v45 = vpop.eup %1003 }
 0x3fb   :  { %440 = vrot.lane.b32.xlu2 %v1004_v45, %s1169_s4 }
 0x455   :  { %v441_v48 = vpop.permute.xlu2 %440 }
 0x456   :  { %v443_v51 = vmul.f32 %v441_v48, %v438_v46 }
 0x458   :  { %v1340_v52 = vadd.f32 %v446_v50, %v443_v51 }
 0x45a   :  { %v454_v53 = vpack.c.bf16 %v1340_v52, %v1340_v52  ;;  %v523_v16 = vrot.slane %v1340_v52, 7 }
 0x45c   :  { %v456_v54 = vrot.slane %v454_v53, 1 }
 0x45e   :  { %457 = vrot.lane.b32.xlu0 %v456_v54, %s1169_s4 }
 0x4d0   :  { %v458_v57 = vpop.permute.xlu0 %457 }
 0x4d1   :  { %947 = vmatmul.msk.bf16.vlgmr.msra.gmra.mxu0 %vm139_vm0, %v458_v57  ;;  %948 = vmatmul.msk.bf16.vlgmr.msra.gmra.mxu1 %vm139_vm0, %v458_v57 }
 0x4d2   :  { %786 = vmatpush.bf16.msra.mxu0 %v1218_v7  ;;  %799 = vmatpush.bf16.msra.mxu1 %v1223_v20 }
 0x4d6   :  { %787 = vmatpush.bf16.msra.mxu0 %v1221_v11  ;;  %800 = vmatpush.bf16.msra.mxu1 %v1229_v31 }
 0x4da   :  { %788 = vmatpush.bf16.msra.mxu0 %v1226_v24  ;;  %801 = vmatpush.bf16.msra.mxu1 %v1235_v41 }
 0x4de   :  { %789 = vmatpush.bf16.msra.mxu0 %v1232_v39  ;;  %802 = vmatpush.bf16.msra.mxu1 %v1240_v49 }
 0x54e   :  { %v471_v58 = vpop.f32.mrf.mxu0  ;;  %v484_v59 = vpop.f32.mrf.mxu1 }
 0x54f   :  { %v472_v60 = vadd.f32 %v471_v58, %v1284_v55  ;;  %v485_v49 = vadd.f32 %v484_v59, %v1290_v8 }
 0x551   :  { %v489_v61 = vrot.slane %v472_v60, 5  ;;  %v512_v6 = vrot.slane %v485_v49, 5 }
 0x553   :  { %v491_v7 = vadd.f32 %v489_v61, %v1286_v56 }
 0x555   :  { %v949_v20 = vmul.f32 -1.442695, %v491_v7 }
 0x556   :  { %v473_v62 = vpop.f32.mrf.mxu0  ;;  %v486_v11 = vpop.f32.mrf.mxu1 }
 0x557   :  { %1005 = vpow2.f32 %v949_v20 }
 0x55d   :  { %v1006_v31 = vpop.eup %1005 }
 0x55e   :  { %v495_v63 = vadd.f32 1.0, %v1006_v31 }
 0x560   :  { %1007 = vrcp.f32 %v495_v63  ;;  %v507_v39 = vand.u32 2147483648, %v495_v63  ;;  %v505_v2 = vand.u32 2147483647, %v495_v63  ;;  %vm501_vm14 = vweird.f32 %v495_v63 }
 0x562   :  { %v508_v4 = vor.u32 1.1754944e-38, %v507_v39  ;;  %vm506_vm1 = vcmp.eq.f32.partialorder %v505_v2, 8.507059e+37 }
 0x566   :  { %v1008_v24 = vpop.eup %1007 }
 0x567   :  { %v497_v41 = vmul.f32 %v1008_v24, %v495_v63  ;;  %vm502_vm13 = vweird.f32 %v1008_v24 }
 0x568   :  { %vm503_vm15 = vmor %vm501_vm14, %vm502_vm13  ;;  %vm294_vm14 = vcmask 516096  }
 0x569   :  { %v498_v0 = vsub.f32 1.0, %v497_v41 }
 0x56b   :  { %v499_v1 = vmul.f32 %v1008_v24, %v498_v0 }
 0x56d   :  { %v500_v3 = vadd.f32 %v1008_v24, %v499_v1 }
 0x56f   :  { %v504_v5 = vsel %vm503_vm15, %v1008_v24, %v500_v3  ;;  %vm531_vm15 = vcmask 519171  }
 0x570   :  { %v509_v10 = vsel %vm506_vm1, %v508_v4, %v504_v5  ;;  %vm372_vm1 = vcmask 517121  }
 0x571   :  { %v514_v12 = vmul.f32 %v512_v6, %v509_v10  ;;  %v517_v15 = vsub.f32 1.0, %v509_v10  ;;  %v525_v18 = vmul.f32 %v523_v16, %v509_v10 }
 0x573   :  { %v515_v13 = vadd.f32 %v514_v12, %v1293_v19 }
 0x575   :  { %1009 = vtanh.f32 %v515_v13 }
 0x57b   :  { %v1010_v14 = vpop.eup %1009 }
 0x57c   :  { %519 = vrot.lane.b32.xlu1 %v1010_v14, %s1169_s4 }
 0x5ee   :  { %v520_v17 = vpop.permute.xlu1 %519 }
 0x5ef   :  { %v522_v21 = vmul.f32 %v520_v17, %v517_v15 }
 0x5f1   :  { %v1361_v22 = vadd.f32 %v525_v18, %v522_v21 }
 0x5f3   :  { %v533_v23 = vpack.c.bf16 %v1361_v22, %v1361_v22  ;;  %v604_v7 = vrot.slane %v1361_v22, 7 }
 0x5f5   :  { %v535_v25 = vshrl.u32 %v533_v23, 16 }
 0x5f7   :  { %v537_v26 = vrot.slane %v535_v25, 1 }
 0x5f9   :  { %538 = vrot.lane.b32.xlu2 %v537_v26, %s1169_s4 }
 0x653   :  { %v539_v27 = vpop.permute.xlu2 %538 }
 0x654   :  { %950 = vmatmul.msk.bf16.vlgmr.msra.gmra.mxu2 %vm139_vm0, %v539_v27  ;;  %951 = vmatmul.msk.bf16.vlgmr.msra.gmra.mxu3 %vm139_vm0, %v539_v27 }
 0x6d7   :  { %v552_v28 = vpop.f32.mrf.mxu2  ;;  %v565_v29 = vpop.f32.mrf.mxu3 }
 0x6d8   :  { %v553_v30 = vadd.f32 %v552_v28, %v1284_v55  ;;  %v566_v46 = vadd.f32 %v565_v29, %v1290_v8 }
 0x6da   :  { %v570_v32 = vrot.slane %v553_v30, 4  ;;  %v593_v54 = vrot.slane %v566_v46, 4 }
 0x6dc   :  { %v572_v34 = vadd.f32 %v570_v32, %v1286_v56 }
 0x6de   :  { %v952_v35 = vmul.f32 -1.442695, %v572_v34 }
 0x6df   :  { %v554_v36 = vpop.f32.mrf.mxu2  ;;  %v567_v37 = vpop.f32.mrf.mxu3 }
 0x6e0   :  { %1011 = vpow2.f32 %v952_v35 }
 0x6e6   :  { %v1012_v38 = vpop.eup %1011 }
 0x6e7   :  { %v576_v40 = vadd.f32 1.0, %v1012_v38 }
 0x6e9   :  { %1013 = vrcp.f32 %v576_v40  ;;  %v588_v45 = vand.u32 2147483648, %v576_v40  ;;  %v586_v48 = vand.u32 2147483647, %v576_v40  ;;  %vm582_vm3 = vweird.f32 %v576_v40 }
 0x6eb   :  { %v589_v51 = vor.u32 1.1754944e-38, %v588_v45  ;;  %vm587_vm5 = vcmp.eq.f32.partialorder %v586_v48, 8.507059e+37 }
 0x6ef   :  { %v1014_v42 = vpop.eup %1013 }
 0x6f0   :  { %v578_v43 = vmul.f32 %v1014_v42, %v576_v40  ;;  %vm583_vm2 = vweird.f32 %v1014_v42 }
 0x6f1   :  { %vm584_vm4 = vmor %vm582_vm3, %vm583_vm2  ;;  %vm612_vm2 = vcmask 520196   ;;  %vm772_vm3 = vcmask 522246  }
 0x6f2   :  { %v579_v44 = vsub.f32 1.0, %v578_v43 }
 0x6f4   :  { %v580_v47 = vmul.f32 %v1014_v42, %v579_v44 }
 0x6f6   :  { %v581_v50 = vadd.f32 %v1014_v42, %v580_v47 }
 0x6f8   :  { %v585_v53 = vsel %vm584_vm4, %v1014_v42, %v581_v50 }
 0x6f9   :  { %v590_v57 = vsel %vm587_vm5, %v589_v51, %v585_v53 }
 0x6fa   :  { %v595_v58 = vmul.f32 %v593_v54, %v590_v57  ;;  %v598_v61 = vsub.f32 1.0, %v590_v57  ;;  %v606_v62 = vmul.f32 %v604_v7, %v590_v57 }
 0x6fc   :  { %v596_v59 = vadd.f32 %v595_v58, %v1293_v19 }
 0x6fe   :  { %1015 = vtanh.f32 %v596_v59 }
 0x704   :  { %v1016_v60 = vpop.eup %1015 }
 0x705   :  { %600 = vrot.lane.b32.xlu0 %v1016_v60, %s1169_s4 }
 0x777   :  { %v601_v20 = vpop.permute.xlu0 %600 }
 0x778   :  { %v603_v11 = vmul.f32 %v601_v20, %v598_v61 }
 0x77a   :  { %v1374_v31 = vadd.f32 %v606_v62, %v603_v11 }
 0x77c   :  { %v614_v63 = vpack.c.bf16 %v1374_v31, %v1374_v31  ;;  %v683_v34 = vrot.slane %v1374_v31, 7 }
 0x77e   :  { %v616_v24 = vrot.slane %v614_v63, 2 }
 0x780   :  { %617 = vrot.lane.b32.xlu1 %v616_v24, %s1169_s4 }
 0x7f2   :  { %v618_v41 = vpop.permute.xlu1 %617 }
 0x7f3   :  { %953 = vmatmul.msk.bf16.vlgmr.msrb.gmra.mxu0 %vm139_vm0, %v618_v41  ;;  %954 = vmatmul.msk.bf16.vlgmr.msrb.gmra.mxu1 %vm139_vm0, %v618_v41 }
 0x870   :  { %v631_v0 = vpop.f32.mrf.mxu0  ;;  %v644_v39 = vpop.f32.mrf.mxu1 }
 0x871   :  { %v632_v49 = vadd.f32 %v631_v0, %v1284_v55  ;;  %v645_v16 = vadd.f32 %v644_v39, %v1290_v8 }
 0x873   :  { %v649_v1 = vrot.slane %v632_v49, 3  ;;  %v672_v26 = vrot.slane %v645_v16, 3 }
 0x875   :  { %v651_v2 = vadd.f32 %v649_v1, %v1286_v56 }
 0x877   :  { %v955_v3 = vmul.f32 -1.442695, %v651_v2 }
 0x878   :  { %v633_v4 = vpop.f32.mrf.mxu0  ;;  %v646_v5 = vpop.f32.mrf.mxu1 }
 0x879   :  { %1017 = vpow2.f32 %v955_v3 }
 0x87f   :  { %v1018_v6 = vpop.eup %1017 }
 0x880   :  { %v655_v10 = vadd.f32 1.0, %v1018_v6 }
 0x882   :  { %1019 = vrcp.f32 %v655_v10  ;;  %v667_v15 = vand.u32 2147483648, %v655_v10  ;;  %v665_v18 = vand.u32 2147483647, %v655_v10  ;;  %vm661_vm7 = vweird.f32 %v655_v10 }
 0x884   :  { %v668_v23 = vor.u32 1.1754944e-38, %v667_v15  ;;  %vm666_vm9 = vcmp.eq.f32.partialorder %v665_v18, 8.507059e+37 }
 0x888   :  { %v1020_v12 = vpop.eup %1019 }
 0x889   :  { %v657_v13 = vmul.f32 %v1020_v12, %v655_v10  ;;  %vm662_vm6 = vweird.f32 %v1020_v12 }
 0x88a   :  { %vm663_vm8 = vmor %vm661_vm7, %vm662_vm6  ;;  %vm452_vm7 = vcmask 518146  }
 0x88b   :  { %v658_v14 = vsub.f32 1.0, %v657_v13 }
 0x88d   :  { %v659_v17 = vmul.f32 %v1020_v12, %v658_v14 }
 0x88f   :  { %v660_v21 = vadd.f32 %v1020_v12, %v659_v17 }
 0x891   :  { %v664_v25 = vsel %vm663_vm8, %v1020_v12, %v660_v21  ;;  %vm691_vm8 = vcmask 521221  }
 0x892   :  { %v669_v27 = vsel %vm666_vm9, %v668_v23, %v664_v25  ;;  %vm851_vm9 = vcmask 523271  }
 0x893   :  { %v674_v28 = vmul.f32 %v672_v26, %v669_v27  ;;  %v677_v32 = vsub.f32 1.0, %v669_v27  ;;  %v685_v36 = vmul.f32 %v683_v34, %v669_v27 }
 0x895   :  { %v675_v29 = vadd.f32 %v674_v28, %v1293_v19 }
 0x897   :  { %1021 = vtanh.f32 %v675_v29 }
 0x89d   :  { %v1022_v30 = vpop.eup %1021 }
 0x89e   :  { %679 = vrot.lane.b32.xlu2 %v1022_v30, %s1169_s4 }
 0x8f8   :  { %v680_v35 = vpop.permute.xlu2 %679 }
 0x8f9   :  { %v682_v37 = vmul.f32 %v680_v35, %v677_v32 }
 0x8fb   :  { %v1387_v38 = vadd.f32 %v685_v36, %v682_v37 }
 0x8fd   :  { %v693_v40 = vpack.c.bf16 %v1387_v38, %v1387_v38  ;;  %v764_v4 = vrot.slane %v1387_v38, 7 }
 0x8ff   :  { %v695_v42 = vshrl.u32 %v693_v40, 16 }
 0x901   :  { %v697_v43 = vrot.slane %v695_v42, 2 }
 0x903   :  { %698 = vrot.lane.b32.xlu0 %v697_v43, %s1169_s4 }
 0x975   :  { %v699_v44 = vpop.permute.xlu0 %698 }
 0x976   :  { %956 = vmatmul.msk.bf16.vlgmr.msrb.gmra.mxu2 %vm139_vm0, %v699_v44  ;;  %957 = vmatmul.msk.bf16.vlgmr.msrb.gmra.mxu3 %vm139_vm0, %v699_v44 }
 0x9f9   :  { %v712_v45 = vpop.f32.mrf.mxu2  ;;  %v725_v46 = vpop.f32.mrf.mxu3 }
 0x9fa   :  { %v713_v47 = vadd.f32 %v712_v45, %v1284_v55  ;;  %v726_v20 = vadd.f32 %v725_v46, %v1290_v8 }
 0x9fc   :  { %v730_v48 = vrot.slane %v713_v47, 2  ;;  %v753_v0 = vrot.slane %v726_v20, 2 }
 0x9fe   :  { %v732_v50 = vadd.f32 %v730_v48, %v1286_v56 }
 0xa00   :  { %v958_v51 = vmul.f32 -1.442695, %v732_v50 }
 0xa01   :  { %v714_v53 = vpop.f32.mrf.mxu2  ;;  %v727_v54 = vpop.f32.mrf.mxu3 }
 0xa02   :  { %1023 = vpow2.f32 %v958_v51 }
 0xa08   :  { %v1024_v57 = vpop.eup %1023 }
 0xa09   :  { %v736_v58 = vadd.f32 1.0, %v1024_v57 }
 0xa0b   :  { %1025 = vrcp.f32 %v736_v58  ;;  %v748_v7 = vand.u32 2147483648, %v736_v58  ;;  %v746_v11 = vand.u32 2147483647, %v736_v58  ;;  %vm742_vm11 = vweird.f32 %v736_v58 }
 0xa0d   :  { %v749_v24 = vor.u32 1.1754944e-38, %v748_v7  ;;  %vm747_vm13 = vcmp.eq.f32.partialorder %v746_v11, 8.507059e+37 }
 0xa11   :  { %v1026_v59 = vpop.eup %1025 }
 0xa12   :  { %v738_v60 = vmul.f32 %v1026_v59, %v736_v58  ;;  %vm743_vm10 = vweird.f32 %v1026_v59 }
 0xa13   :  { %vm744_vm12 = vmor %vm742_vm11, %vm743_vm10 }
 0xa14   :  { %v739_v61 = vsub.f32 1.0, %v738_v60 }
 0xa16   :  { %v740_v62 = vmul.f32 %v1026_v59, %v739_v61 }
 0xa18   :  { %v741_v63 = vadd.f32 %v1026_v59, %v740_v62 }
 0xa1a   :  { %v745_v41 = vsel %vm744_vm12, %v1026_v59, %v741_v63 }
 0xa1b   :  { %v750_v39 = vsel %vm747_vm13, %v749_v24, %v745_v41 }
 0xa1c   :  { %v755_v49 = vmul.f32 %v753_v0, %v750_v39  ;;  %v758_v3 = vsub.f32 1.0, %v750_v39  ;;  %v766_v6 = vmul.f32 %v764_v4, %v750_v39 }
 0xa1e   :  { %v756_v1 = vadd.f32 %v755_v49, %v1293_v19 }
 0xa20   :  { %1027 = vtanh.f32 %v756_v1 }
 0xa26   :  { %v1028_v2 = vpop.eup %1027 }
 0xa27   :  { %760 = vrot.lane.b32.xlu1 %v1028_v2, %s1169_s4 }
 0xa2f   :  { %291 = vrot.lane.b32.xlu1 %v1298_v33, %s1169_s4 }
 0xa37   :  { %528 = vrot.lane.b32.xlu1 %v1361_v22, %s1169_s4 }
 0xa99   :  { %v761_v5 = vpop.permute.xlu1 %760 }
 0xa9a   :  { %v763_v10 = vmul.f32 %v761_v5, %v758_v3 }
 0xa9c   :  { %v767_v12 = vadd.f32 %v766_v6, %v763_v10 }
 0xa9e   :  { %769 = vrot.lane.b32.xlu1 %v767_v12, %s1169_s4  ;;  %v774_v13 = vpack.c.bf16 %v767_v12, %v767_v12  ;;  %v843_v45 = vrot.slane %v767_v12, 7 }
 0xaa0   :  { %v776_v14 = vrot.slane %v774_v13, 3 }
 0xaa1   :  { %v292_v15 = vpop.permute.xlu1 %291 }
 0xaa2   :  { %295 = vst.msk [vmem:[#allocation10] sm:$0x1] %vm294_vm14, %v292_v15  ;;  %777 = vrot.lane.b32.xlu2 %v776_v14, %s1169_s4 }
 0xaa9   :  { %v529_v33 = vpop.permute.xlu1 %528 }
 0xaaa   :  { %532 = vst.msk [vmem:[#allocation10] sm:$0x8] %vm531_vm15, %v529_v33  ;;  %369 = vrot.lane.b32.xlu2 %v1319_v9, %s1169_s4 }
 0xab2   :  { %609 = vrot.lane.b32.xlu2 %v1374_v31, %s1169_s4 }
 0xafc   :  { %v778_v22 = vpop.permute.xlu2 %777 }
 0xafd   :  { %959 = vmatmul.msk.bf16.vlgmr.msra.gmra.mxu0 %vm139_vm0, %v778_v22  ;;  %960 = vmatmul.msk.bf16.vlgmr.msra.gmra.mxu1 %vm139_vm0, %v778_v22 }
 0xb04   :  { %v370_v16 = vpop.permute.xlu2 %369 }
 0xb05   :  { %373 = vst.msk [vmem:[#allocation10] sm:$0x2] %vm372_vm1, %v370_v16 }
 0xb0c   :  { %v610_v17 = vpop.permute.xlu2 %609 }
 0xb0d   :  { %613 = vst.msk [vmem:[#allocation10] sm:$0x10] %vm612_vm2, %v610_v17 }
 0xb10   :  { %v770_v18 = vpop.permute.xlu1 %769 }
 0xb11   :  { %773 = vst.msk [vmem:[#allocation10] sm:$0x40] %vm772_vm3, %v770_v18 }
 0xb7a   :  { %v791_v21 = vpop.f32.mrf.mxu0  ;;  %v804_v23 = vpop.f32.mrf.mxu1 }
 0xb7b   :  { %v792_v9 = vadd.f32 %v791_v21, %v1284_v55  ;;  %v805_v37 = vadd.f32 %v804_v23, %v1290_v8 }
 0xb7d   :  { %v809_v25 = vrot.slane %v792_v9, 1  ;;  %v832_v44 = vrot.slane %v805_v37, 1 }
 0xb7f   :  { %v811_v31 = vadd.f32 %v809_v25, %v1286_v56 }
 0xb81   :  { %v961_v26 = vmul.f32 -1.442695, %v811_v31 }
 0xb82   :  { %v793_v27 = vpop.f32.mrf.mxu0  ;;  %v806_v28 = vpop.f32.mrf.mxu1 }
 0xb83   :  { %1029 = vpow2.f32 %v961_v26 }
 0xb89   :  { %v1030_v29 = vpop.eup %1029 }
 0xb8a   :  { %v815_v30 = vadd.f32 1.0, %v1030_v29 }
 0xb8c   :  { %1031 = vrcp.f32 %v815_v30  ;;  %v827_v36 = vand.u32 2147483648, %v815_v30  ;;  %v825_v42 = vand.u32 2147483647, %v815_v30  ;;  %vm821_vm4 = vweird.f32 %v815_v30 }
 0xb8e   :  { %v828_v56 = vor.u32 1.1754944e-38, %v827_v36  ;;  %vm826_vm6 = vcmp.eq.f32.partialorder %v825_v42, 8.507059e+37 }
 0xb92   :  { %v1032_v32 = vpop.eup %1031 }
 0xb93   :  { %v817_v34 = vmul.f32 %v1032_v32, %v815_v30  ;;  %vm822_vm0 = vweird.f32 %v1032_v32 }
 0xb94   :  { %vm823_vm5 = vmor %vm821_vm4, %vm822_vm0 }
 0xb95   :  { %v818_v35 = vsub.f32 1.0, %v817_v34 }
 0xb97   :  { %v819_v40 = vmul.f32 %v1032_v32, %v818_v35 }
 0xb99   :  { %v820_v55 = vadd.f32 %v1032_v32, %v819_v40 }
 0xb9b   :  { %v824_v43 = vsel %vm823_vm5, %v1032_v32, %v820_v55 }
 0xb9c   :  { %v829_v46 = vsel %vm826_vm6, %v828_v56, %v824_v43 }
 0xb9d   :  { %v834_v47 = vmul.f32 %v832_v44, %v829_v46  ;;  %v845_v48 = vmul.f32 %v843_v45, %v829_v46  ;;  %v837_v8 = vsub.f32 1.0, %v829_v46 }
 0xb9f   :  { %v835_v50 = vadd.f32 %v834_v47, %v1293_v19 }
 0xba1   :  { %1033 = vtanh.f32 %v835_v50 }
 0xba7   :  { %v1034_v51 = vpop.eup %1033 }
 0xba8   :  { %839 = vrot.lane.b32.xlu0 %v1034_v51, %s1169_s4 }
 0xbb0   :  { %449 = vrot.lane.b32.xlu0 %v1340_v52, %s1169_s4 }
 0xbb8   :  { %688 = vrot.lane.b32.xlu0 %v1387_v38, %s1169_s4 }
 0xc1a   :  { %v840_v53 = vpop.permute.xlu0 %839 }
 0xc1b   :  { %v842_v54 = vmul.f32 %v840_v53, %v837_v8 }
 0xc1d   :  { %v846_v57 = vadd.f32 %v845_v48, %v842_v54 }
 0xc1f   :  { %848 = vrot.lane.b32.xlu2 %v846_v57, %s1169_s4 }
 0xc22   :  { %v450_v58 = vpop.permute.xlu0 %449 }
 0xc23   :  { %453 = vst.msk [vmem:[#allocation10] sm:$0x4] %vm452_vm7, %v450_v58 }
 0xc2a   :  { %v689_v19 = vpop.permute.xlu0 %688 }
 0xc2b   :  { %692 = vst.msk [vmem:[#allocation10] sm:$0x20] %vm691_vm8, %v689_v19 }
 0xc79   :  { %v849_v52 = vpop.permute.xlu2 %848 }
 0xc7a   :  { %852 = vst.msk [vmem:[#allocation10] sm:$0x80] %vm851_vm9, %v849_v52 }
 0xc7b   :  { %863 = dma.vmem_to_hbm [thread:$0]  %s859_s19, 128, %s861_s22, [#allocation4]  }
 0xc7c   :  { %1161 = dma.done.wait [#allocation4], 128  }
 0xc7d   :  { %1162 = vsyncadd [#allocation4], 4294967168 }
 0xc7e   :  { %868 = vsyncpa [#allocation3], 1 }
 0xc7f   :  { %869 = vsyncpa [#allocation6], 1 }
 0xc80   :  { %870 = vsyncpa [#allocation9], 1 }
 0xc81   :  { %871 = vsyncpa [#allocation4], 1 }

</bundles_post_ra>
